<compile_context>
chip_gen: v6e
topology: v6e:2x2x1
jax: 0.10.0
libtpu: 0.0.40
codegen_flags: <defaults>
</compile_context>

<pallas_src>
import functools

import numpy as np

import jax
import jax.numpy as jnp
from jax.experimental import pallas as pl
from jax.experimental.pallas import tpu as pltpu


# ----------------------------------------------------------------------------
# Fused Pallas kernel: one grid step == one sub-batch of BT images.
# ----------------------------------------------------------------------------

def _fused_hybrid_kernel(x_ref, bm_ref, w1_ref, w2_ref, wf1_ref, wf2_ref,
                         mask_ref, logit_ref, *, H, W, BT, LPAD):
    HW = H * W
    N = BT * HW

    x = x_ref[0]                       # (C, N) lane-dense (BT images concat in lanes)
    bm = bm_ref[...]                   # (9, N) f32 border-validity masks (per tap)
    ones_row = jnp.ones((1, N), jnp.float32)   # bias row, built once, reused

    def conv3x3(a, w_aug):
        # a: (Cin, N); w_aug: (Cout, 9*Cin + 1) with bias folded in last column.
        # In-VMEM im2col: 9 lane-rolled taps (XLU) * precomputed border mask,
        # stacked along sublanes -> ONE MXU matmul per conv.
        taps = []
        t = 0
        for dr in (-1, 0, 1):
            for dc in (-1, 0, 1):
                off = dr * W + dc
                if off == 0:
                    rolled = a
                else:
                    rolled = pltpu.roll(a, shift=(-off) % N, axis=1)
                # border mask zeroes wrapped lanes and cross-image leakage
                taps.append(rolled * bm[t:t + 1, :])
                t += 1
        taps.append(ones_row)                                   # bias term
        patch = jnp.concatenate(taps, axis=0)                   # (9*Cin+1, N)
        return jnp.dot(w_aug, patch, preferred_element_type=jnp.float32)

    # --- segmentation stand-in: conv3x3 -> ReLU -> conv3x3 -> sigmoid -------
    h1 = jnp.maximum(conv3x3(x, w1_ref[...]), 0.0)              # (Cs, N)
    seg = conv3x3(h1, w2_ref[...])                              # (1, N)
    m = jax.nn.sigmoid(seg)                                     # (1, N)
    mask_ref[...] = m[None]                                     # lane-dense store

    # --- hard threshold + masking (f32 compare == (mask > 0.5).float()) -----
    gate = (m > 0.5).astype(jnp.float32)                        # (1, N)
    masked = x * gate                                           # (C, N)

    # --- classifier stand-in: per-image GAP -> Linear -> ReLU -> Linear -----
    C = masked.shape[0]
    if BT == 1:
        pooled = jnp.sum(masked, axis=1, keepdims=True) * (1.0 / HW)      # (C, 1)
    else:
        pooled = jnp.sum(masked.reshape(C, BT, HW), axis=2) * (1.0 / HW)  # (C, BT)

    ones_bt = jnp.ones((1, BT), jnp.float32)
    pooled_aug = jnp.concatenate([pooled, ones_bt], axis=0)               # (C+1, BT)
    h = jnp.maximum(
        jnp.dot(wf1_ref[...], pooled_aug, preferred_element_type=jnp.float32),
        0.0)                                                              # (Hc, BT)
    h_aug = jnp.concatenate([h, ones_bt], axis=0)                         # (Hc+1, BT)
    logit = jnp.dot(wf2_ref[...], h_aug, preferred_element_type=jnp.float32)  # (1, BT)

    # lane-dense logit store (pad to LPAD lanes; real values in lanes [0:BT])
    if LPAD > BT:
        logit = jnp.concatenate(
            [logit, jnp.zeros((1, LPAD - BT), jnp.float32)], axis=1)
    logit_ref[...] = logit[None]                                          # (1, 1, LPAD)


def _border_masks(H, W, BT):
    """(9, BT*H*W) f32: validity of each 3x3 tap for every lane position."""
    r = np.arange(H)[:, None]
    c = np.arange(W)[None, :]
    rows = []
    for dr in (-1, 0, 1):
        for dc in (-1, 0, 1):
            valid = ((r + dr >= 0) & (r + dr < H) &
                     (c + dc >= 0) & (c + dc < W))
            rows.append(valid.astype(np.float32).reshape(H * W))
    bm = np.stack(rows, axis=0)                    # (9, HW), tap row-major
    return jnp.asarray(np.tile(bm, (1, BT)))       # (9, BT*HW)


def hybrid_model_forward(params, x_nchw):
    """Mirrors HybridModel.forward: returns (mask (B,1,H,W), logit (B,1))."""
    B, C, H, W = x_nchw.shape
    HW = H * W

    # >=2 grid steps when possible so v7x's two TensorCores both get work.
    if B >= 2 and B % 2 == 0:
        G, BT = 2, B // 2
    else:
        G, BT = B, 1
    N = BT * HW
    LPAD = max(128, ((BT + 127) // 128) * 128)     # lane-dense logit width

    # (G, C, BT*HW): BT images concatenated along the lane axis per grid step.
    x_flat = x_nchw.astype(jnp.float32).reshape(G, BT, C, HW)
    x_flat = jnp.transpose(x_flat, (0, 2, 1, 3)).reshape(G, C, N)

    bm = _border_masks(H, W, BT)                   # compile-time constant

    w1, b1 = params["w_conv1"], params["b_conv1"]  # (9,Cs,C), (Cs,1)
    w2, b2 = params["w_conv2"], params["b_conv2"]  # (9,1,Cs), (1,1)
    wf1, bf1 = params["w_fc1"], params["b_fc1"]    # (Hc,C),   (Hc,1)
    wf2, bf2 = params["w_fc2"], params["b_fc2"]    # (1,Hc),   (1,1)
    Cs = w1.shape[1]

    # Pre-reshape + bias-fold host-side: (Cout, 9*Cin+1) per conv, (Co, Ci+1) per FC.
    w1a = jnp.concatenate(
        [jnp.transpose(w1, (1, 0, 2)).reshape(Cs, 9 * C), b1], axis=1)
    w2a = jnp.concatenate(
        [jnp.transpose(w2, (1, 0, 2)).reshape(1, 9 * Cs), b2], axis=1)
    wf1a = jnp.concatenate([wf1, bf1], axis=1)
    wf2a = jnp.concatenate([wf2, bf2], axis=1)

    kernel = functools.partial(_fused_hybrid_kernel, H=H, W=W, BT=BT, LPAD=LPAD)

    mask_flat, logit_pad = pl.pallas_call(
        kernel,
        out_shape=(
            jax.ShapeDtypeStruct((G, 1, N), jnp.float32),
            jax.ShapeDtypeStruct((G, 1, LPAD), jnp.float32),
        ),
        grid=(G,),
        in_specs=[
            pl.BlockSpec((1, C, N), lambda g: (g, 0, 0)),
            pl.BlockSpec(bm.shape, lambda g: (0, 0)),
            pl.BlockSpec(w1a.shape, lambda g: (0, 0)),
            pl.BlockSpec(w2a.shape, lambda g: (0, 0)),
            pl.BlockSpec(wf1a.shape, lambda g: (0, 0)),
            pl.BlockSpec(wf2a.shape, lambda g: (0, 0)),
        ],
        out_specs=(
            pl.BlockSpec((1, 1, N), lambda g: (g, 0, 0)),
            pl.BlockSpec((1, 1, LPAD), lambda g: (g, 0, 0)),
        ),
        compiler_params=pltpu.CompilerParams(
            dimension_semantics=("parallel",),      # megacore: split sub-batches
            vmem_limit_bytes=32 * 1024 * 1024,      # explicit; fits v7x's 64 MiB too
        ),
    )(x_flat, bm, w1a, w2a, wf1a, wf2a)

    mask = mask_flat.reshape(B, 1, H, W)            # free reshape outside kernel
    logit = logit_pad[:, 0, :BT].reshape(B, 1)
    return mask, logit


# ----------------------------------------------------------------------------
# Params (stand-in weights) and a pure-JAX reference for self-checking.
# ----------------------------------------------------------------------------

def init_params(key, c_in=3, seg_hidden=8, clf_hidden=32):
    ks = jax.random.split(key, 8)
    return {
        # seg conv1: 3x3, c_in -> seg_hidden; per-tap layout (9, Cout, Cin),
        # taps row-major over the 3x3 window.
        "w_conv1": 0.1 * jax.random.normal(ks[0], (9, seg_hidden, c_in), jnp.float32),
        "b_conv1": 0.1 * jax.random.normal(ks[1], (seg_hidden, 1), jnp.float32),
        # seg conv2: 3x3, seg_hidden -> 1
        "w_conv2": 0.1 * jax.random.normal(ks[2], (9, 1, seg_hidden), jnp.float32),
        "b_conv2": 0.1 * jax.random.normal(ks[3], (1, 1), jnp.float32),
        # classifier head: GAP -> Linear(c_in, clf_hidden) -> ReLU -> Linear(clf_hidden, 1)
        "w_fc1": 0.5 * jax.random.normal(ks[4], (clf_hidden, c_in), jnp.float32),
        "b_fc1": 0.1 * jax.random.normal(ks[5], (clf_hidden, 1), jnp.float32),
        "w_fc2": 0.5 * jax.random.normal(ks[6], (1, clf_hidden), jnp.float32),
        "b_fc2": 0.1 * jax.random.normal(ks[7], (1, 1), jnp.float32),
    }


def reference_forward(params, x_nchw):
    """Pure-JAX reference (same stand-in weights) used as a structural check."""
    hp = jax.lax.Precision.HIGHEST
    B, C, H, W = x_nchw.shape
    x = jnp.transpose(x_nchw, (0, 2, 3, 1)).astype(jnp.float32)   # NHWC

    def conv3x3(inp, w_taps, b):          # w_taps: (9, Cout, Cin), b: (Cout, 1)
        Bi, Hi, Wi, Ci = inp.shape
        Co = w_taps.shape[1]
        xp = jnp.pad(inp, ((0, 0), (1, 1), (1, 1), (0, 0)))
        out = jnp.zeros((Bi, Hi, Wi, Co), jnp.float32) + b[:, 0]
        t = 0
        for di in range(3):
            for dj in range(3):
                patch = xp[:, di:di + Hi, dj:dj + Wi, :]
                out = out + jnp.einsum("bhwc,oc->bhwo", patch, w_taps[t],
                                       precision=hp)
                t += 1
        return out

    h1 = jnp.maximum(conv3x3(x, params["w_conv1"], params["b_conv1"]), 0.0)
    seg = conv3x3(h1, params["w_conv2"], params["b_conv2"])        # (B,H,W,1)
    mask = jax.nn.sigmoid(seg)
    masked = x * (mask > 0.5).astype(jnp.float32)
    pooled = jnp.mean(masked, axis=(1, 2))                         # (B, C)
    h = jnp.maximum(jnp.dot(pooled, params["w_fc1"].T, precision=hp)
                    + params["b_fc1"][:, 0], 0.0)
    logit = jnp.dot(h, params["w_fc2"].T, precision=hp) + params["b_fc2"][:, 0]
    return jnp.transpose(mask, (0, 3, 1, 2)), logit


# ----------------------------------------------------------------------------
# Main
# ----------------------------------------------------------------------------

if __name__ == "__main__":
    key = jax.random.PRNGKey(0)
    k_x, k_p = jax.random.split(key)

    B, C, H, W = 2, 3, 16, 16
    x = jax.random.normal(k_x, (B, C, H, W), jnp.float32)
    params = init_params(k_p, c_in=C, seg_hidden=8, clf_hidden=32)

    mask, logit = jax.jit(hybrid_model_forward)(params, x)
    jax.block_until_ready((mask, logit))

    assert mask.shape == (B, 1, H, W), mask.shape
    assert logit.shape == (B, 1), logit.shape
    assert bool(jnp.all(jnp.isfinite(mask))) and bool(jnp.all(jnp.isfinite(logit)))

    # Pure-JAX reference self-check. Structural bugs (wrong tap/weight/shift
    # indexing) produce O(0.1..1) errors; MXU-vs-HIGHEST precision produces
    # O(1e-6) errors. The hard 0.5 gate can, in principle, flip for pixels with
    # sigmoid ~= 0.5 under precision differences — handled explicitly below so
    # the check is robust without hiding real bugs.
    mask_r, logit_r = reference_forward(params, x)
    mask_err = float(jnp.max(jnp.abs(mask - mask_r)))
    assert mask_err < 2e-3, ("mask mismatch", mask_err)

    gate_k = mask > 0.5
    gate_r = mask_r > 0.5
    n_flips = int(jnp.sum(gate_k != gate_r))
    logit_err = float(jnp.max(jnp.abs(logit - logit_r)))
    if n_flips == 0:
        assert logit_err < 2e-2, ("logit mismatch", logit_err)
    else:
        near_thresh = jnp.abs(mask_r - 0.5) < 1e-3
        assert bool(jnp.all(jnp.where(gate_k != gate_r, near_thresh, True))), \
            "gate flipped at a pixel far from the 0.5 threshold"
        assert logit_err < 2e-1, ("logit mismatch (near-0.5 gate flips)", logit_err)

    print("KERNEL_OK")
</pallas_src>

<mosaic_0001>
module attributes {stable_mosaic.version = 11 : i64} {
  func.func @_fused_hybrid_kernel(%arg0: i32, %arg1: memref<1x3x256xf32, #tpu.memory_space<vmem>>, %arg2: memref<9x256xf32, #tpu.memory_space<vmem>>, %arg3: memref<8x28xf32, #tpu.memory_space<vmem>>, %arg4: memref<1x73xf32, #tpu.memory_space<vmem>>, %arg5: memref<32x4xf32, #tpu.memory_space<vmem>>, %arg6: memref<1x33xf32, #tpu.memory_space<vmem>>, %arg7: memref<1x1x256xf32, #tpu.memory_space<vmem>>, %arg8: memref<1x1x128xf32, #tpu.memory_space<vmem>>) attributes {dimension_semantics = [#tpu.dimension_semantics<parallel>], iteration_bounds = array<i64: 2>, scalar_prefetch = 0 : i64, scratch_operands = 0 : i64, tpu.core_type = #tpu.core_type<tc>, window_params = [{transform_indices = @transform_0, window_bounds = array<i64: 1, 3, 256>}, {pipeline_mode = #tpu.pipeline_mode<synchronous>, transform_indices = @transform_1, window_bounds = array<i64: 9, 256>}, {pipeline_mode = #tpu.pipeline_mode<synchronous>, transform_indices = @transform_2, window_bounds = array<i64: 8, 28>}, {pipeline_mode = #tpu.pipeline_mode<synchronous>, transform_indices = @transform_3, window_bounds = array<i64: 1, 73>}, {pipeline_mode = #tpu.pipeline_mode<synchronous>, transform_indices = @transform_4, window_bounds = array<i64: 32, 4>}, {pipeline_mode = #tpu.pipeline_mode<synchronous>, transform_indices = @transform_5, window_bounds = array<i64: 1, 33>}, {transform_indices = @transform_6, window_bounds = array<i64: 1, 1, 256>}, {transform_indices = @transform_7, window_bounds = array<i64: 1, 1, 128>}]} {
    %c0 = arith.constant 0 : index
    %c0_0 = arith.constant 0 : index
    %c0_1 = arith.constant 0 : index
    %0 = vector.load %arg1[%c0, %c0_0, %c0_1] : memref<1x3x256xf32, #tpu.memory_space<vmem>>, vector<1x3x256xf32>
    %1 = vector.shape_cast %0 : vector<1x3x256xf32> to vector<3x256xf32>
    %c0_2 = arith.constant 0 : index
    %c0_3 = arith.constant 0 : index
    %2 = vector.load %arg2[%c0_2, %c0_3] : memref<9x256xf32, #tpu.memory_space<vmem>>, vector<9x256xf32>
    %cst = arith.constant 1.000000e+00 : f32
    %3 = vector.broadcast %cst : f32 to vector<1x256xf32>
    %c0_4 = arith.constant 0 : index
    %c0_5 = arith.constant 0 : index
    %4 = vector.load %arg3[%c0_4, %c0_5] : memref<8x28xf32, #tpu.memory_space<vmem>>, vector<8x28xf32>
    %c17_i32 = arith.constant 17 : i32
    %5 = tpu.dynamic_rotate %1 by %c17_i32 dim 1 : vector<3x256xf32>, i32 -> vector<3x256xf32>
    %6 = vector.extract_strided_slice %2 {offsets = [0, 0], sizes = [1, 256], strides = [1, 1]} : vector<9x256xf32> to vector<1x256xf32>
    %7 = vector.broadcast %6 : vector<1x256xf32> to vector<3x256xf32>
    %8 = arith.mulf %5, %7 : vector<3x256xf32>
    %c16_i32 = arith.constant 16 : i32
    %9 = tpu.dynamic_rotate %1 by %c16_i32 dim 1 : vector<3x256xf32>, i32 -> vector<3x256xf32>
    %10 = vector.extract_strided_slice %2 {offsets = [1, 0], sizes = [1, 256], strides = [1, 1]} : vector<9x256xf32> to vector<1x256xf32>
    %11 = vector.broadcast %10 : vector<1x256xf32> to vector<3x256xf32>
    %12 = arith.mulf %9, %11 : vector<3x256xf32>
    %c15_i32 = arith.constant 15 : i32
    %13 = tpu.dynamic_rotate %1 by %c15_i32 dim 1 : vector<3x256xf32>, i32 -> vector<3x256xf32>
    %14 = vector.extract_strided_slice %2 {offsets = [2, 0], sizes = [1, 256], strides = [1, 1]} : vector<9x256xf32> to vector<1x256xf32>
    %15 = vector.broadcast %14 : vector<1x256xf32> to vector<3x256xf32>
    %16 = arith.mulf %13, %15 : vector<3x256xf32>
    %c1_i32 = arith.constant 1 : i32
    %17 = tpu.dynamic_rotate %1 by %c1_i32 dim 1 : vector<3x256xf32>, i32 -> vector<3x256xf32>
    %18 = vector.extract_strided_slice %2 {offsets = [3, 0], sizes = [1, 256], strides = [1, 1]} : vector<9x256xf32> to vector<1x256xf32>
    %19 = vector.broadcast %18 : vector<1x256xf32> to vector<3x256xf32>
    %20 = arith.mulf %17, %19 : vector<3x256xf32>
    %21 = vector.extract_strided_slice %2 {offsets = [4, 0], sizes = [1, 256], strides = [1, 1]} : vector<9x256xf32> to vector<1x256xf32>
    %22 = vector.broadcast %21 : vector<1x256xf32> to vector<3x256xf32>
    %23 = arith.mulf %1, %22 : vector<3x256xf32>
    %c255_i32 = arith.constant 255 : i32
    %24 = tpu.dynamic_rotate %1 by %c255_i32 dim 1 : vector<3x256xf32>, i32 -> vector<3x256xf32>
    %25 = vector.extract_strided_slice %2 {offsets = [5, 0], sizes = [1, 256], strides = [1, 1]} : vector<9x256xf32> to vector<1x256xf32>
    %26 = vector.broadcast %25 : vector<1x256xf32> to vector<3x256xf32>
    %27 = arith.mulf %24, %26 : vector<3x256xf32>
    %c241_i32 = arith.constant 241 : i32
    %28 = tpu.dynamic_rotate %1 by %c241_i32 dim 1 : vector<3x256xf32>, i32 -> vector<3x256xf32>
    %29 = vector.extract_strided_slice %2 {offsets = [6, 0], sizes = [1, 256], strides = [1, 1]} : vector<9x256xf32> to vector<1x256xf32>
    %30 = vector.broadcast %29 : vector<1x256xf32> to vector<3x256xf32>
    %31 = arith.mulf %28, %30 : vector<3x256xf32>
    %c240_i32 = arith.constant 240 : i32
    %32 = tpu.dynamic_rotate %1 by %c240_i32 dim 1 : vector<3x256xf32>, i32 -> vector<3x256xf32>
    %33 = vector.extract_strided_slice %2 {offsets = [7, 0], sizes = [1, 256], strides = [1, 1]} : vector<9x256xf32> to vector<1x256xf32>
    %34 = vector.broadcast %33 : vector<1x256xf32> to vector<3x256xf32>
    %35 = arith.mulf %32, %34 : vector<3x256xf32>
    %c239_i32 = arith.constant 239 : i32
    %36 = tpu.dynamic_rotate %1 by %c239_i32 dim 1 : vector<3x256xf32>, i32 -> vector<3x256xf32>
    %37 = vector.extract_strided_slice %2 {offsets = [8, 0], sizes = [1, 256], strides = [1, 1]} : vector<9x256xf32> to vector<1x256xf32>
    %38 = vector.broadcast %37 : vector<1x256xf32> to vector<3x256xf32>
    %39 = arith.mulf %36, %38 : vector<3x256xf32>
    %40 = tpu.concatenate %8, %12, %16, %20, %23, %27, %31, %35, %39, %3 in 0 : vector<3x256xf32>, vector<3x256xf32>, vector<3x256xf32>, vector<3x256xf32>, vector<3x256xf32>, vector<3x256xf32>, vector<3x256xf32>, vector<3x256xf32>, vector<3x256xf32>, vector<1x256xf32> -> vector<28x256xf32>
    %cst_6 = arith.constant dense<0.000000e+00> : vector<8x256xf32>
    %41 = tpu.matmul %4, %40, %cst_6 {dimension_numbers = #tpu.dot_dimension_numbers<[1], [0], [0], [1], [0, 0, 1, 1], [], []>} : vector<8x28xf32>, vector<28x256xf32>, vector<8x256xf32> -> vector<8x256xf32>
    %cst_7 = arith.constant 0.000000e+00 : f32
    %42 = vector.broadcast %cst_7 : f32 to vector<8x256xf32>
    %43 = arith.maximumf %41, %42 : vector<8x256xf32>
    %c0_8 = arith.constant 0 : index
    %c0_9 = arith.constant 0 : index
    %44 = vector.load %arg4[%c0_8, %c0_9] : memref<1x73xf32, #tpu.memory_space<vmem>>, vector<1x73xf32>
    %c17_i32_10 = arith.constant 17 : i32
    %45 = tpu.dynamic_rotate %43 by %c17_i32_10 dim 1 : vector<8x256xf32>, i32 -> vector<8x256xf32>
    %46 = vector.extract_strided_slice %2 {offsets = [0, 0], sizes = [1, 256], strides = [1, 1]} : vector<9x256xf32> to vector<1x256xf32>
    %47 = vector.broadcast %46 : vector<1x256xf32> to vector<8x256xf32>
    %48 = arith.mulf %45, %47 : vector<8x256xf32>
    %c16_i32_11 = arith.constant 16 : i32
    %49 = tpu.dynamic_rotate %43 by %c16_i32_11 dim 1 : vector<8x256xf32>, i32 -> vector<8x256xf32>
    %50 = vector.extract_strided_slice %2 {offsets = [1, 0], sizes = [1, 256], strides = [1, 1]} : vector<9x256xf32> to vector<1x256xf32>
    %51 = vector.broadcast %50 : vector<1x256xf32> to vector<8x256xf32>
    %52 = arith.mulf %49, %51 : vector<8x256xf32>
    %c15_i32_12 = arith.constant 15 : i32
    %53 = tpu.dynamic_rotate %43 by %c15_i32_12 dim 1 : vector<8x256xf32>, i32 -> vector<8x256xf32>
    %54 = vector.extract_strided_slice %2 {offsets = [2, 0], sizes = [1, 256], strides = [1, 1]} : vector<9x256xf32> to vector<1x256xf32>
    %55 = vector.broadcast %54 : vector<1x256xf32> to vector<8x256xf32>
    %56 = arith.mulf %53, %55 : vector<8x256xf32>
    %c1_i32_13 = arith.constant 1 : i32
    %57 = tpu.dynamic_rotate %43 by %c1_i32_13 dim 1 : vector<8x256xf32>, i32 -> vector<8x256xf32>
    %58 = vector.extract_strided_slice %2 {offsets = [3, 0], sizes = [1, 256], strides = [1, 1]} : vector<9x256xf32> to vector<1x256xf32>
    %59 = vector.broadcast %58 : vector<1x256xf32> to vector<8x256xf32>
    %60 = arith.mulf %57, %59 : vector<8x256xf32>
    %61 = vector.extract_strided_slice %2 {offsets = [4, 0], sizes = [1, 256], strides = [1, 1]} : vector<9x256xf32> to vector<1x256xf32>
    %62 = vector.broadcast %61 : vector<1x256xf32> to vector<8x256xf32>
    %63 = arith.mulf %43, %62 : vector<8x256xf32>
    %c255_i32_14 = arith.constant 255 : i32
    %64 = tpu.dynamic_rotate %43 by %c255_i32_14 dim 1 : vector<8x256xf32>, i32 -> vector<8x256xf32>
    %65 = vector.extract_strided_slice %2 {offsets = [5, 0], sizes = [1, 256], strides = [1, 1]} : vector<9x256xf32> to vector<1x256xf32>
    %66 = vector.broadcast %65 : vector<1x256xf32> to vector<8x256xf32>
    %67 = arith.mulf %64, %66 : vector<8x256xf32>
    %c241_i32_15 = arith.constant 241 : i32
    %68 = tpu.dynamic_rotate %43 by %c241_i32_15 dim 1 : vector<8x256xf32>, i32 -> vector<8x256xf32>
    %69 = vector.extract_strided_slice %2 {offsets = [6, 0], sizes = [1, 256], strides = [1, 1]} : vector<9x256xf32> to vector<1x256xf32>
    %70 = vector.broadcast %69 : vector<1x256xf32> to vector<8x256xf32>
    %71 = arith.mulf %68, %70 : vector<8x256xf32>
    %c240_i32_16 = arith.constant 240 : i32
    %72 = tpu.dynamic_rotate %43 by %c240_i32_16 dim 1 : vector<8x256xf32>, i32 -> vector<8x256xf32>
    %73 = vector.extract_strided_slice %2 {offsets = [7, 0], sizes = [1, 256], strides = [1, 1]} : vector<9x256xf32> to vector<1x256xf32>
    %74 = vector.broadcast %73 : vector<1x256xf32> to vector<8x256xf32>
    %75 = arith.mulf %72, %74 : vector<8x256xf32>
    %c239_i32_17 = arith.constant 239 : i32
    %76 = tpu.dynamic_rotate %43 by %c239_i32_17 dim 1 : vector<8x256xf32>, i32 -> vector<8x256xf32>
    %77 = vector.extract_strided_slice %2 {offsets = [8, 0], sizes = [1, 256], strides = [1, 1]} : vector<9x256xf32> to vector<1x256xf32>
    %78 = vector.broadcast %77 : vector<1x256xf32> to vector<8x256xf32>
    %79 = arith.mulf %76, %78 : vector<8x256xf32>
    %80 = tpu.concatenate %48, %52, %56, %60, %63, %67, %71, %75, %79, %3 in 0 : vector<8x256xf32>, vector<8x256xf32>, vector<8x256xf32>, vector<8x256xf32>, vector<8x256xf32>, vector<8x256xf32>, vector<8x256xf32>, vector<8x256xf32>, vector<8x256xf32>, vector<1x256xf32> -> vector<73x256xf32>
    %cst_18 = arith.constant dense<0.000000e+00> : vector<1x256xf32>
    %81 = tpu.matmul %44, %80, %cst_18 {dimension_numbers = #tpu.dot_dimension_numbers<[1], [0], [0], [1], [0, 0, 1, 1], [], []>} : vector<1x73xf32>, vector<73x256xf32>, vector<1x256xf32> -> vector<1x256xf32>
    %82 = arith.negf %81 : vector<1x256xf32>
    %83 = math.exp %82 : vector<1x256xf32>
    %cst_19 = arith.constant 1.000000e+00 : f32
    %84 = vector.broadcast %cst_19 : f32 to vector<1x256xf32>
    %85 = arith.addf %84, %83 : vector<1x256xf32>
    %86 = arith.divf %84, %85 : vector<1x256xf32>
    %87 = vector.shape_cast %86 : vector<1x256xf32> to vector<1x1x256xf32>
    %c0_20 = arith.constant 0 : index
    %c0_21 = arith.constant 0 : index
    %c0_22 = arith.constant 0 : index
    %88 = vector.load %arg7[%c0_20, %c0_21, %c0_22] : memref<1x1x256xf32, #tpu.memory_space<vmem>>, vector<1x1x256xf32>
    tpu.vector_store %arg7[%c0_20, %c0_21, %c0_22], %87 {strides = array<i32>} : memref<1x1x256xf32, #tpu.memory_space<vmem>>, vector<1x1x256xf32>,
    %cst_23 = arith.constant 5.000000e-01 : f32
    %89 = vector.broadcast %cst_23 : f32 to vector<1x256xf32>
    %90 = arith.cmpf ogt, %86, %89 : vector<1x256xf32>
    %91 = arith.extui %90 : vector<1x256xi1> to vector<1x256xi32>
    %92 = arith.sitofp %91 : vector<1x256xi32> to vector<1x256xf32>
    %93 = vector.broadcast %92 : vector<1x256xf32> to vector<3x256xf32>
    %94 = arith.mulf %1, %93 : vector<3x256xf32>
    %cst_24 = arith.constant dense<0.000000e+00> : vector<3xf32>
    %95 = vector.multi_reduction <add>, %94, %cst_24 [1] : vector<3x256xf32> to vector<3xf32>
    %96 = vector.shape_cast %95 : vector<3xf32> to vector<3x1xf32>
    %cst_25 = arith.constant 3.906250e-03 : f32
    %97 = vector.broadcast %cst_25 : f32 to vector<3x1xf32>
    %98 = arith.mulf %96, %97 : vector<3x1xf32>
    %cst_26 = arith.constant 1.000000e+00 : f32
    %99 = vector.broadcast %cst_26 : f32 to vector<1x1xf32>
    %100 = tpu.concatenate %98, %99 in 0 : vector<3x1xf32>, vector<1x1xf32> -> vector<4x1xf32>
    %c0_27 = arith.constant 0 : index
    %c0_28 = arith.constant 0 : index
    %101 = vector.load %arg5[%c0_27, %c0_28] : memref<32x4xf32, #tpu.memory_space<vmem>>, vector<32x4xf32>
    %cst_29 = arith.constant dense<0.000000e+00> : vector<32x1xf32>
    %102 = tpu.matmul %101, %100, %cst_29 {dimension_numbers = #tpu.dot_dimension_numbers<[1], [0], [0], [1], [0, 0, 1, 1], [], []>} : vector<32x4xf32>, vector<4x1xf32>, vector<32x1xf32> -> vector<32x1xf32>
    %cst_30 = arith.constant 0.000000e+00 : f32
    %103 = vector.broadcast %cst_30 : f32 to vector<32x1xf32>
    %104 = arith.maximumf %102, %103 : vector<32x1xf32>
    %105 = tpu.concatenate %104, %99 in 0 : vector<32x1xf32>, vector<1x1xf32> -> vector<33x1xf32>
    %c0_31 = arith.constant 0 : index
    %c0_32 = arith.constant 0 : index
    %106 = vector.load %arg6[%c0_31, %c0_32] : memref<1x33xf32, #tpu.memory_space<vmem>>, vector<1x33xf32>
    %cst_33 = arith.constant dense<0.000000e+00> : vector<1x1xf32>
    %107 = tpu.matmul %106, %105, %cst_33 {dimension_numbers = #tpu.dot_dimension_numbers<[1], [0], [0], [1], [0, 0, 1, 1], [], []>} : vector<1x33xf32>, vector<33x1xf32>, vector<1x1xf32> -> vector<1x1xf32>
    %cst_34 = arith.constant 0.000000e+00 : f32
    %108 = vector.broadcast %cst_34 : f32 to vector<1x127xf32>
    %109 = tpu.concatenate %107, %108 in 1 : vector<1x1xf32>, vector<1x127xf32> -> vector<1x128xf32>
    %110 = vector.shape_cast %109 : vector<1x128xf32> to vector<1x1x128xf32>
    %c0_35 = arith.constant 0 : index
    %c0_36 = arith.constant 0 : index
    %c0_37 = arith.constant 0 : index
    %111 = vector.load %arg8[%c0_35, %c0_36, %c0_37] : memref<1x1x128xf32, #tpu.memory_space<vmem>>, vector<1x1x128xf32>
    tpu.vector_store %arg8[%c0_35, %c0_36, %c0_37], %110 {strides = array<i32>} : memref<1x1x128xf32, #tpu.memory_space<vmem>>, vector<1x1x128xf32>,
    return
  }
  func.func @transform_0(%arg0: i32) -> (i32, i32, i32) {
    %c0_i32 = arith.constant 0 : i32
    %c0_i32_0 = arith.constant 0 : i32
    %c0_i32_1 = arith.constant 0 : i32
    return %arg0, %c0_i32, %c0_i32_0 : i32, i32, i32
  }
  func.func @transform_1(%arg0: i32) -> (i32, i32) {
    %c0_i32 = arith.constant 0 : i32
    %c0_i32_0 = arith.constant 0 : i32
    %c0_i32_1 = arith.constant 0 : i32
    return %c0_i32, %c0_i32_0 : i32, i32
  }
  func.func @transform_2(%arg0: i32) -> (i32, i32) {
    %c0_i32 = arith.constant 0 : i32
    %c0_i32_0 = arith.constant 0 : i32
    %c0_i32_1 = arith.constant 0 : i32
    return %c0_i32, %c0_i32_0 : i32, i32
  }
  func.func @transform_3(%arg0: i32) -> (i32, i32) {
    %c0_i32 = arith.constant 0 : i32
    %c0_i32_0 = arith.constant 0 : i32
    %c0_i32_1 = arith.constant 0 : i32
    return %c0_i32, %c0_i32_0 : i32, i32
  }
  func.func @transform_4(%arg0: i32) -> (i32, i32) {
    %c0_i32 = arith.constant 0 : i32
    %c0_i32_0 = arith.constant 0 : i32
    %c0_i32_1 = arith.constant 0 : i32
    return %c0_i32, %c0_i32_0 : i32, i32
  }
  func.func @transform_5(%arg0: i32) -> (i32, i32) {
    %c0_i32 = arith.constant 0 : i32
    %c0_i32_0 = arith.constant 0 : i32
    %c0_i32_1 = arith.constant 0 : i32
    return %c0_i32, %c0_i32_0 : i32, i32
  }
  func.func @transform_6(%arg0: i32) -> (i32, i32, i32) {
    %c0_i32 = arith.constant 0 : i32
    %c0_i32_0 = arith.constant 0 : i32
    %c0_i32_1 = arith.constant 0 : i32
    return %arg0, %c0_i32, %c0_i32_0 : i32, i32, i32
  }
  func.func @transform_7(%arg0: i32) -> (i32, i32, i32) {
    %c0_i32 = arith.constant 0 : i32
    %c0_i32_0 = arith.constant 0 : i32
    %c0_i32_1 = arith.constant 0 : i32
    return %arg0, %c0_i32, %c0_i32_0 : i32, i32, i32
  }
}

</mosaic_0001>

<bundles_post_ra>
// kernel: hybrid_model_forward.1
= control target key start
LH: loop header
LB: loop body
LE: loop exit
PB: predicated region body
PF: predicated region fallthrough
CT: control target
= control target key end

     0   :  { %s1216_s24 = smov 0   ;;  %s1554_s0 = inlined_call_operand.vmem [shape: f32[2,3,256], index: 0, kind: input, shape index: {}]   ;;  %s1555_s1 = inlined_call_operand.vmem [shape: f32[9,256], index: 1, kind: input, shape index: {}]   ;;  %s1556_s2 = inlined_call_operand.vmem [shape: f32[8,28], index: 2, kind: input, shape index: {}]   ;;  %s1557_s3 = inlined_call_operand.vmem [shape: f32[1,73], index: 3, kind: input, shape index: {}]   ;;  %s1558_s4 = inlined_call_operand.vmem [shape: f32[32,4], index: 4, kind: input, shape index: {}]   ;;  %s1559_s5 = inlined_call_operand.vmem [shape: f32[1,33], index: 5, kind: input, shape index: {}]   ;;  %s1560_s6 = inlined_call_operand.vmem [shape: f32[2,1,256], index: 6, kind: output, shape index: {0}]   ;;  %s1561_s7 = inlined_call_operand.vmem [shape: f32[2,1,128], index: 7, kind: output, shape index: {1}]  }
   0x1 LB: > { %s1065_s25 = sadd.s32 4294967295, %s1162_s24   ;;  %p1069_p0 = scmp.ge.s32.totalorder %s1162_s24, 1  ;;  %s1162_s24 = sphi %s1216_s24, %s18_s24  }
   0x2   : > { %p240_p1 = scmp.lt.s32.totalorder %s1162_s24, 3 }
   0x4   : > { %p241_p2 = pnand %p1069_p0, %p240_p1 }
   0x5   : > { %p274_p3 = scmp.lt.s32.totalorder (!%p241_p2), %s1065_s25, 1  ;;  %s1164_s30 = smov (!%p241_p2), 113  }
   0x6   : > { %244 = sbr.rel (%p241_p2) target bundleno = 1294 (0x50e), region = 44  ;;  %s1165_s8 = smov (!%p241_p2), 127  }
   0x7   : > { %s1166_s9 = smov (!%p241_p2), 15   ;;  %s1167_s10 = smov (!%p241_p2), 1  }
   0x8   : > { %s1168_s11 = smov (!%p241_p2), 112   ;;  %s1169_s12 = smov (!%p241_p2), 111  }
   0x9   : > { %s1171_s13 = smov (!%p241_p2), 16   ;;  %s1172_s14 = smov (!%p241_p2), 17  }
   0xb   : > { %s1563_s25 = smov (!%p274_p3, %s1065_s25), 1  ;;  %v1170_v2 = vmov 0.0   ;;  %v299_v3 = vlaneseq  ;;  %v1267_v8 = vld [vmem:[%s1555_s1] sm:$0xff]  ;;  %v1272_v9 = vld [vmem:[%s1555_s1 + $0x8] sm:$0xff]  ;;  %vm491_vm6 = vcmask 1040384   ;;  %vm500_vm7 = vcmask 1041408  }
   0xc   : > { %s1094_s26 = sshll.u32 %s1563_s25, 3  ;;  %582 = vmatprep.mubr.f32.mxu0 %v1170_v2  ;;  %729 = vmatprep.mubr.f32.mxu1 %v1170_v2  ;;  %vm494_vm8 = vcmask 1043456   ;;  %vm485_vm10 = vcmask 1042432   ;;  %vm503_vm11 = vcmask 1044480   ;;  %vm497_vm12 = vcmask 1046528   ;;  %s285_s22 = scalar_lea.vmem %s1561_s7, %s1563_s25 }
   0xd   : > { %s278_s29 = scalar_lea.vmem %s1554_s0, %s1094_s26  ;;  %v1261_v4 = vshrl.u32 %v299_v3, 7  ;;  %v1281_v13 = vand.u32 127, %v299_v3  ;;  %vm488_vm14 = vcmask 1045504   ;;  %vm508_vm15 = vcmask 228352  }
   0xe   : > { %v1230_v0 = vld [vmem:[%s278_s29] sm:$0x77]  ;;  %s1072_s29 = sshll.u32 %s1563_s25, 1 }
   0xf   : > { %395 = vrot.lane.b32.xlu1 %v1230_v0, %s1164_s30  ;;  %378 = vrot.lane.b32.xlu0 %v1230_v0, %s1165_s8  ;;  %v293_v1 = vcombine.high %v1230_v0, %v1230_v0  ;;  %v367_v5 = vsub.s32 4, %v1261_v4  ;;  %v404_v15 = vsub.s32 6, %v1261_v4  ;;  %v340_v16 = vsub.s32 2, %v1261_v4 }
  0x10   : > { %v387_v17 = vsub.s32 5, %v1261_v4  ;;  %v357_v18 = vsub.s32 3, %v1261_v4  ;;  %v421_v19 = vsub.s32 7, %v1261_v4  ;;  %vm399_vm0 = vcmp.lt.s32.totalorder %v1281_v13, 113 }
  0x11   : > { %v1275_v10 = vrot.slane %v1267_v8, %v367_v5  ;;  %v1278_v11 = vrot.slane %v1272_v9, %v367_v5  ;;  %vm335_vm1 = vcmp.lt.s32.totalorder %v1281_v13, 15  ;;  %vm382_vm2 = vcmp.lt.s32.totalorder %v1281_v13, 127  ;;  %v1381_v5 = vld [vmem:[%s1555_s1 + $0x18] ss:$0 sm:$0xff] }
  0x12   : > { %v1294_v23 = vrot.slane %v1267_v8, %v404_v15  ;;  %v1297_v24 = vrot.slane %v1272_v9, %v404_v15  ;;  %v1300_v25 = vrot.slane %v1267_v8, %v340_v16  ;;  %vm352_vm3 = vcmp.lt.s32.totalorder %v1281_v13, 1 }
  0x13   : > { %331 = vrot.lane.b32.xlu0 %v1230_v0, %s1166_s9  ;;  %397 = vrot.lane.b32.xlu1 %v293_v1, %s1164_s30  ;;  %v375_v20 = vcombine.low %v1275_v10, %v1278_v11  ;;  %v1304_v26 = vrot.slane %v1272_v9, %v340_v16  ;;  %v1307_v27 = vrot.slane %v1267_v8, %v387_v17  ;;  %vm416_vm4 = vcmp.lt.s32.totalorder %v1281_v13, 112 }
  0x14   : > { %v1310_v28 = vrot.slane %v1272_v9, %v387_v17  ;;  %v1313_v29 = vrot.slane %v1272_v9, %v357_v18  ;;  %v1316_v30 = vrot.slane %v1267_v8, %v357_v18  ;;  %v1320_v31 = vrot.slane %v1267_v8, %v421_v19 }
  0x15   : > { %v1323_v32 = vmul.f32 %v375_v20, %v1230_v0  ;;  %v1328_v36 = vrot.slane %v1272_v9, %v421_v19  ;;  %vm433_vm5 = vcmp.lt.s32.totalorder %v1281_v13, 111  ;;  %v323_v44 = vsub.s32 1, %v1261_v4 }
  0x16   : > { %vm318_vm9 = vcmp.lt.s32.totalorder %v1281_v13, 16  ;;  %vm301_vm13 = vcmp.lt.s32.totalorder %v1281_v13, 17 }
  0x17   : > { %333 = vrot.lane.b32.xlu1 %v293_v1, %s1166_s9  ;;  %380 = vrot.lane.b32.xlu0 %v293_v1, %s1165_s8  ;;  %v465_v46 = vcombine.low %v1323_v32, %v1323_v32  ;;  %v1366_v59 = vrot.slane %v1267_v8, %v323_v44  ;;  %v1369_v60 = vrot.slane %v1272_v9, %v323_v44 }
  0x1b   : > { %350 = vrot.lane.b32.xlu1 %v293_v1, %s1167_s10  ;;  %348 = vrot.lane.b32.xlu0 %v1230_v0, %s1167_s10 }
  0x1f   : > { %414 = vrot.lane.b32.xlu1 %v293_v1, %s1168_s11  ;;  %412 = vrot.lane.b32.xlu0 %v1230_v0, %s1168_s11 }
  0x23   : > { %431 = vrot.lane.b32.xlu1 %v293_v1, %s1169_s12  ;;  %429 = vrot.lane.b32.xlu0 %v1230_v0, %s1169_s12 }
  0x27   : > { %316 = vrot.lane.b32.xlu1 %v293_v1, %s1171_s13  ;;  %314 = vrot.lane.b32.xlu0 %v1230_v0, %s1171_s13 }
  0x2b   : > { %297 = vrot.lane.b32.xlu1 %v293_v1, %s1172_s14  ;;  %295 = vrot.lane.b32.xlu0 %v1230_v0, %s1172_s14  ;;  %v1376_v1 = vld [vmem:[%s1555_s1 + $0x10] ss:$0 sm:$0xff] }
  0x81   : > { %v396_v6 = vpop.permute.xlu1 %395  ;;  %v379_v7 = vpop.permute.xlu0 %378 }
  0x85   : > { %v332_v12 = vpop.permute.xlu0 %331  ;;  %v398_v14 = vpop.permute.xlu1 %397 }
  0x86   : > { %v401_v33 = vsel %vm399_vm0, %v398_v14, %v396_v6  ;;  %v400_v47 = vsel %vm399_vm0, %v396_v6, %v398_v14  ;;  %v1384_v6 = vsub.s32 0, %v1261_v4 }
  0x87   : > { %v411_v48 = vmul.f32 %v1297_v24, %v401_v33  ;;  %v410_v61 = vmul.f32 %v1294_v23, %v400_v47 }
  0x89   : > { %v334_v21 = vpop.permute.xlu1 %333  ;;  %v381_v22 = vpop.permute.xlu0 %380 }
  0x8a   : > { %v336_v37 = vsel %vm335_vm1, %v332_v12, %v334_v21  ;;  %v384_v38 = vsel %vm382_vm2, %v381_v22, %v379_v7  ;;  %v337_v41 = vsel %vm335_vm1, %v334_v21, %v332_v12  ;;  %v383_v42 = vsel %vm382_vm2, %v379_v7, %v381_v22 }
  0x8b   : > { %v1353_v49 = vmul.f32 %v1304_v26, %v336_v37  ;;  %v394_v50 = vmul.f32 %v1310_v28, %v384_v38  ;;  %v1357_v53 = vmul.f32 %v1300_v25, %v337_v41  ;;  %v393_v54 = vmul.f32 %v1307_v27, %v383_v42 }
  0x8c   : > { %v476_v7 = vrot.slane %v411_v48, 6  ;;  %v1398_v38 = vrot.slane %v1267_v8, %v1384_v6 }
  0x8d   : > { %v351_v34 = vpop.permute.xlu1 %350  ;;  %v349_v35 = vpop.permute.xlu0 %348  ;;  %v455_v12 = vrot.slane %v1353_v49, 2  ;;  %v470_v14 = vrot.slane %v394_v50, 1  ;;  %v454_v17 = vrot.slane %v1357_v53, 2  ;;  %v469_v18 = vrot.slane %v393_v54, 1 }
  0x8e   : > { %v353_v39 = vsel %vm352_vm3, %v349_v35, %v351_v34  ;;  %v354_v40 = vsel %vm352_vm3, %v351_v34, %v349_v35  ;;  %v475_v35 = vrot.slane %v410_v61, 6 }
  0x8f   : > { %v364_v43 = vmul.f32 %v1313_v29, %v353_v39  ;;  %v363_v45 = vmul.f32 %v1316_v30, %v354_v40  ;;  %v502_v44 = vsel %vm500_vm7, %v470_v14, %v476_v7 }
  0x90   : > { %v501_v48 = vsel %vm500_vm7, %v469_v18, %v475_v35  ;;  %vm984_vm7 = vcmask 7168  }
  0x91   : > { %v415_v51 = vpop.permute.xlu1 %414  ;;  %v413_v52 = vpop.permute.xlu0 %412  ;;  %v461_v57 = vrot.slane %v364_v43, 7  ;;  %v460_v62 = vrot.slane %v363_v45, 7  ;;  %v1406_v45 = vrot.slane %v1272_v9, %v1384_v6 }
  0x92   : > { %v417_v55 = vsel %vm416_vm4, %v413_v52, %v415_v51  ;;  %v418_v56 = vsel %vm416_vm4, %v415_v51, %v413_v52 }
  0x93   : > { %v428_v58 = vmul.f32 %v1328_v36, %v418_v56  ;;  %v427_v63 = vmul.f32 %v1320_v31, %v417_v55  ;;  %v493_v34 = vsel %vm491_vm6, %v455_v12, %v461_v57  ;;  %v492_v39 = vsel %vm491_vm6, %v454_v17, %v460_v62 }
  0x94   : > { %v496_v49 = vsel %vm494_vm8, %v493_v34, %v1323_v32  ;;  %v495_v52 = vsel %vm494_vm8, %v492_v39, %v465_v46 }
  0x95   : > { %v432_v15 = vpop.permute.xlu1 %431  ;;  %v430_v16 = vpop.permute.xlu0 %429  ;;  %v482_v21 = vrot.slane %v428_v58, 3  ;;  %v481_v37 = vrot.slane %v427_v63, 3  ;;  %v499_v56 = vsel %vm497_vm12, %v496_v49, %v470_v14  ;;  %v498_v58 = vsel %vm497_vm12, %v495_v52, %v469_v18 }
  0x96   : > { %v434_v19 = vsel %vm433_vm5, %v430_v16, %v432_v15  ;;  %v435_v20 = vsel %vm433_vm5, %v432_v15, %v430_v16  ;;  %v1173_v18 = vmov 1.0  }
  0x97   : > { %v444_v22 = vmul.f32 %v1376_v1, %v434_v19  ;;  %v445_v33 = vmul.f32 %v1381_v5, %v435_v20  ;;  %v505_v9 = vsel %vm503_vm11, %v502_v44, %v482_v21  ;;  %v504_v53 = vsel %vm503_vm11, %v501_v48, %v481_v37  ;;  %v291_v19 = vld [vmem:[%s1556_s2] sm:$0xff]  ;;  %1078 = vmatprep.subr.msk.mxu1 %vm491_vm6, %v1173_v18 }
  0x98   : > { %1079 = vmatpush1.msk.msra.mxu1 %vm491_vm6, %v1173_v18 }
  0x99   : > { %v317_v40 = vpop.permute.xlu1 %316  ;;  %v315_v41 = vpop.permute.xlu0 %314  ;;  %v507_v42 = vsel %vm485_vm10, %v445_v33, 1.0  ;;  %v506_v43 = vsel %vm485_vm10, %v444_v22, 1.0 }
  0x9a   : > { %v319_v47 = vsel %vm318_vm9, %v315_v41, %v317_v40  ;;  %v320_v8 = vsel %vm318_vm9, %v317_v40, %v315_v41  ;;  %1075 = vmatprep.subr.msk.mxu0 %vm494_vm8, %v507_v42 }
  0x9b   : > { %v329_v50 = vmul.f32 %v1366_v59, %v320_v8  ;;  %v330_v51 = vmul.f32 %v1369_v60, %v319_v47  ;;  %1076 = vmatpush1.msk.msra.mxu0 %vm494_vm8, %v506_v43 }
  0x9c   : > { %544 = vmatprep.subr.mxu0 %v505_v9 }
  0x9d   : > { %v298_v54 = vpop.permute.xlu1 %297  ;;  %545 = vmatpush1.msra.mxu0 %v504_v53  ;;  %v296_v55 = vpop.permute.xlu0 %295  ;;  %v448_v61 = vrot.slane %v329_v50, 5  ;;  %v449_v46 = vrot.slane %v330_v51, 5 }
  0x9e   : > { %v302_v32 = vsel %vm301_vm13, %v296_v55, %v298_v54  ;;  %v303_v57 = vsel %vm301_vm13, %v298_v54, %v296_v55  ;;  %546 = vmatprep.subr.mxu0 %v499_v56 }
  0x9f   : > { %v312_v62 = vmul.f32 %v1398_v38, %v303_v57  ;;  %v313_v63 = vmul.f32 %v1406_v45, %v302_v32  ;;  %547 = vmatpush1.msra.mxu0 %v498_v58 }
  0xa1   : > { %v487_v7 = vsel %vm485_vm10, %v313_v63, %v449_v46  ;;  %v486_v14 = vsel %vm485_vm10, %v312_v62, %v448_v61 }
  0xa2   : > { %v490_v15 = vsel %vm488_vm14, %v487_v7, %v455_v12  ;;  %v489_v16 = vsel %vm488_vm14, %v486_v14, %v454_v17 }
  0xa3   : > { %548 = vmatprep.subr.mxu0 %v490_v15 }
  0xa4   : > { %549 = vmatpush1.msra.mxu0 %v489_v16 }
  0xa5   : > { %1077 = vmatmul.mubr.msk.f32.vlgmr.msra.gmra.mxu0 %vm508_vm15, %v291_v19 }
 0x165   : > { %v584_v20 = vpop.f32.mrf.mxu0 }
 0x166   : > { %v589_v21 = vmax.f32 %v584_v20, 0.0 }
 0x167   : > { %v586_v22 = vpop.f32.mrf.mxu0 }
 0x168   : > { %v590_v12 = vmax.f32 %v586_v22, 0.0  ;;  %650 = vrot.lane.b32.xlu0 %v589_v21, %s1169_s12  ;;  %v624_v32 = vmul.f32 %v589_v21, %v1275_v10 }
 0x16a   : > { %652 = vrot.lane.b32.xlu1 %v590_v12, %s1169_s12 }
 0x16c   : > { %642 = vrot.lane.b32.xlu0 %v589_v21, %s1168_s11 }
 0x16e   : > { %644 = vrot.lane.b32.xlu1 %v590_v12, %s1168_s11 }
 0x170   : > { %634 = vrot.lane.b32.xlu0 %v589_v21, %s1164_s30 }
 0x172   : > { %636 = vrot.lane.b32.xlu1 %v590_v12, %s1164_s30 }
 0x174   : > { %626 = vrot.lane.b32.xlu0 %v589_v21, %s1165_s8 }
 0x176   : > { %628 = vrot.lane.b32.xlu1 %v590_v12, %s1165_s8 }
 0x178   : > { %616 = vrot.lane.b32.xlu0 %v589_v21, %s1167_s10 }
 0x17a   : > { %618 = vrot.lane.b32.xlu1 %v590_v12, %s1167_s10 }
 0x17c   : > { %608 = vrot.lane.b32.xlu0 %v589_v21, %s1166_s9 }
 0x17e   : > { %610 = vrot.lane.b32.xlu1 %v590_v12, %s1166_s9  ;;  %s282_s9 = scalar_lea.vmem %s1560_s6, %s1072_s29 }
 0x180   : > { %600 = vrot.lane.b32.xlu0 %v589_v21, %s1171_s13 }
 0x182   : > { %602 = vrot.lane.b32.xlu1 %v590_v12, %s1171_s13 }
 0x184   : > { %592 = vrot.lane.b32.xlu0 %v589_v21, %s1172_s14 }
 0x186   : > { %594 = vrot.lane.b32.xlu1 %v590_v12, %s1172_s14 }
 0x1da   : > { %v651_v17 = vpop.permute.xlu0 %650 }
 0x1dc   : > { %v653_v33 = vpop.permute.xlu1 %652 }
 0x1dd   : > { %v654_v34 = vsel %vm433_vm5, %v651_v17, %v653_v33  ;;  %v655_v35 = vsel %vm433_vm5, %v653_v33, %v651_v17  ;;  %v1174_v33 = vmov 1966171168   ;;  %vm1175_vm5 = vmmov 0  }
 0x1de   : > { %v656_v37 = vmul.f32 %v1376_v1, %v654_v34  ;;  %v657_v39 = vmul.f32 %v1381_v5, %v655_v35  ;;  %v643_v40 = vpop.permute.xlu0 %642  ;;  %v752_v34 = vunpack.c.l.s4 %v1174_v33 }
 0x1e0   : > { %679 = vmatprep.subr.mxu1 %v657_v39  ;;  %v645_v41 = vpop.permute.xlu1 %644  ;;  %v753_v35 = vunpack.c.0.s8 %v752_v34 }
 0x1e1   : > { %v646_v42 = vsel %vm416_vm4, %v643_v40, %v645_v41  ;;  %v647_v43 = vsel %vm416_vm4, %v645_v41, %v643_v40  ;;  %680 = vmatpush1.msra.mxu1 %v656_v37  ;;  %vm804_vm4 = vcmask 31744  }
 0x1e2   : > { %v648_v44 = vmul.f32 %v646_v42, %v1320_v31  ;;  %v649_v47 = vmul.f32 %v647_v43, %v1328_v36  ;;  %v635_v8 = vpop.permute.xlu0 %634  ;;  %v756_v39 = vsub.s32 %v753_v35, %v1261_v4 }
 0x1e4   : > { %681 = vmatprep.subr.mxu1 %v649_v47  ;;  %v637_v48 = vpop.permute.xlu1 %636 }
 0x1e5   : > { %v638_v1 = vsel %vm399_vm0, %v635_v8, %v637_v48  ;;  %v639_v5 = vsel %vm399_vm0, %v637_v48, %v635_v8  ;;  %682 = vmatpush1.msra.mxu1 %v648_v44  ;;  %vm658_vm0 = vcmask 596992  }
 0x1e6   : > { %v640_v49 = vmul.f32 %v638_v1, %v1294_v23  ;;  %v641_v50 = vmul.f32 %v639_v5, %v1297_v24  ;;  %v627_v51 = vpop.permute.xlu0 %626  ;;  %v625_v23 = vmul.f32 %v590_v12, %v1278_v11 }
 0x1e8   : > { %683 = vmatprep.subr.mxu1 %v641_v50  ;;  %v629_v9 = vpop.permute.xlu1 %628 }
 0x1e9   : > { %v630_v31 = vsel %vm382_vm2, %v627_v51, %v629_v9  ;;  %v631_v36 = vsel %vm382_vm2, %v629_v9, %v627_v51  ;;  %684 = vmatpush1.msra.mxu1 %v640_v49 }
 0x1ea   : > { %v632_v52 = vmul.f32 %v630_v31, %v1307_v27  ;;  %v633_v53 = vmul.f32 %v631_v36, %v1310_v28  ;;  %v617_v54 = vpop.permute.xlu0 %616  ;;  %v802_v36 = vld [vmem:[%s1558_s4 + $0x10] sm:$0xff] }
 0x1ec   : > { %685 = vmatprep.subr.mxu1 %v633_v53  ;;  %v619_v55 = vpop.permute.xlu1 %618 }
 0x1ed   : > { %v620_v24 = vsel %vm352_vm3, %v617_v54, %v619_v55  ;;  %v621_v56 = vsel %vm352_vm3, %v619_v55, %v617_v54  ;;  %686 = vmatpush1.msra.mxu1 %v632_v52  ;;  %vm768_vm3 = vcmp.lt.s32.totalorder %v299_v3, 256  ;;  %v803_v52 = vld [vmem:[%s1558_s4 + $0x18] sm:$0xff] }
 0x1ee   : > { %v622_v57 = vmul.f32 %v621_v56, %v1316_v30  ;;  %v623_v27 = vmul.f32 %v620_v24, %v1313_v29  ;;  %v609_v58 = vpop.permute.xlu0 %608  ;;  %687 = vmatprep.subr.mxu1 %v625_v23 }
 0x1ef   : > { %688 = vmatpush1.msra.mxu1 %v624_v32 }
 0x1f0   : > { %v611_v28 = vpop.permute.xlu1 %610  ;;  %689 = vmatprep.subr.mxu1 %v623_v27 }
 0x1f1   : > { %v612_v11 = vsel %vm335_vm1, %v609_v58, %v611_v28  ;;  %v613_v61 = vsel %vm335_vm1, %v611_v28, %v609_v58  ;;  %690 = vmatpush1.msra.mxu1 %v622_v57  ;;  %v909_v57 = vld [vmem:[%s1559_s5] sm:$0x1] }
 0x1f2   : > { %v614_v46 = vmul.f32 %v613_v61, %v1300_v25  ;;  %v615_v10 = vmul.f32 %v612_v11, %v1304_v26  ;;  %v601_v62 = vpop.permute.xlu0 %600 }
 0x1f4   : > { %v603_v30 = vpop.permute.xlu1 %602  ;;  %691 = vmatprep.subr.mxu1 %v615_v10 }
 0x1f5   : > { %v604_v29 = vsel %vm318_vm9, %v601_v62, %v603_v30  ;;  %v605_v63 = vsel %vm318_vm9, %v603_v30, %v601_v62  ;;  %692 = vmatpush1.msra.mxu1 %v614_v46 }
 0x1f6   : > { %v606_v7 = vmul.f32 %v605_v63, %v1366_v59  ;;  %v607_v14 = vmul.f32 %v604_v29, %v1369_v60  ;;  %v593_v15 = vpop.permute.xlu0 %592  ;;  %v591_v59 = vld [vmem:[%s1557_s3] sm:$0x1] }
 0x1f8   : > { %v595_v16 = vpop.permute.xlu1 %594  ;;  %693 = vmatprep.subr.mxu1 %v607_v14 }
 0x1f9   : > { %v596_v25 = vsel %vm301_vm13, %v593_v15, %v595_v16  ;;  %v597_v26 = vsel %vm301_vm13, %v595_v16, %v593_v15  ;;  %694 = vmatpush1.msra.mxu1 %v606_v7 }
 0x1fa   : > { %v598_v19 = vmul.f32 %v597_v26, %v1398_v38  ;;  %v599_v20 = vmul.f32 %v596_v25, %v1406_v45 }
 0x1fc   : > { %695 = vmatprep.subr.mxu1 %v599_v20 }
 0x1fd   : > { %696 = vmatpush1.msra.mxu1 %v598_v19 }
 0x1fe   : > { %1080 = vmatmul.mubr.msk.f32.vlgmr.msra.gmra.mxu1 %vm658_vm0, %v591_v59 }
 0x2be   : > { %v731_v60 = vpop.f32.mrf.mxu1 }
 0x2bf   : > { %v1081_v21 = vmul.f32 -1.442695, %v731_v60 }
 0x2c0   : > { %v733_v22 = vpop.f32.mrf.mxu1 }
 0x2c1   : > { %1148 = vpow2.f32 %v1081_v21  ;;  %v1082_v12 = vmul.f32 -1.442695, %v733_v22 }
 0x2c3   : > { %1150 = vpow2.f32 %v1082_v12 }
 0x2ce   : > { %v1149_v13 = vpop.eup %1148 }
 0x2cf   : > { %v742_v17 = vadd.f32 1.0, %v1149_v13 }
 0x2d0   : > { %v1151_v38 = vpop.eup %1150 }
 0x2d1   : > { %1152 = vrcp.f32 %v742_v17  ;;  %v743_v45 = vadd.f32 1.0, %v1151_v38 }
 0x2d3   : > { %1154 = vrcp.f32 %v743_v45 }
 0x2de   : > { %v1153_v37 = vpop.eup %1152 }
 0x2df   : > { %vm771_vm1 = vcmp.gt.f32.partialorder %v1153_v37, 0.5 }
 0x2e0   : > { %v1155_v40 = vpop.eup %1154  ;;  %v1083_v41 = vsel %vm771_vm1, 1.0, %v1170_v2 }
 0x2e1   : > { %v750_v42 = vcombine.low %v1153_v37, %v1155_v40  ;;  %vm772_vm2 = vcmp.gt.f32.partialorder %v1155_v40, 0.5  ;;  %v780_v47 = vrot.slane %v1083_v41, %v1384_v6 }
 0x2e2   : > { %v1084_v43 = vsel %vm772_vm2, 1.0, %v1170_v2 }
 0x2e3   : > { %v757_v44 = vrot.slane %v750_v42, %v756_v39  ;;  %v784_v8 = vrot.slane %v1084_v43, %v1384_v6  ;;  %v800_v6 = vld [vmem:[%s1558_s4] sm:$0xff] }
 0x2e4   : > { %1108 = vmatprep.mubr.msk.f32.mxu0 %vm804_vm4, %v800_v6 }
 0x2e5   : > { %v764_v4 = vrot.slane %v757_v44, %v756_v39  ;;  %v787_v48 = vcombine.low %v780_v47, %v784_v8 }
 0x2e7   : > { %770 = vst.msk [vmem:[%s282_s9] sm:$0x3] %vm768_vm3, %v764_v4  ;;  %v789_v1 = vmul.f32 %v787_v48, %v1230_v0  ;;  %v801_v0 = vld [vmem:[%s1558_s4 + $0x8] sm:$0xff] }
 0x2e9   : > { %v791_v5 = vcombine.high %v789_v1, %v789_v1  ;;  %v793_v49 = vsel %vm485_vm10, %v789_v1, 0.0 }
 0x2eb   : > { %v794_v50 = vsel %vm485_vm10, %v791_v5, 0.0 }
 0x2ec   : > { %v795_v51 = vadd.f32 %v794_v50, %v793_v49 }
 0x2ee   : > { %796 = vadd.xlane.f32.xlu0 %v795_v51 }
 0x377   : > { %v797_v9 = vpop.xlane.xlu0 %796 }
 0x378   : > { %v798_v3 = vmul.f32 0.00390625, %v797_v9 }
 0x37a   : > { %v799_v31 = vsel %vm485_vm10, %v798_v3, 1.0 }
 0x37b   : > { %1106 = vmatprep.subr.msk.mxu0 %vm494_vm8, %v799_v31 }
 0x37c   : > { %1107 = vmatpush3.msk.msra.mxu0 %vm494_vm8, %v799_v31 }
 0x37d   : > { %1109 = vmatmul.mubr.msk.f32.vlgmr.msra.gmra.mxu0 %vm804_vm4, %v801_v0  ;;  %1114 = vmatprep.subr.mxu0 %v1170_v2 }
 0x37e   : > { %1111 = vmatprep.mubr.msk.f32.mxu0 %vm804_vm4, %v802_v36  ;;  %1115 = vmatpush3.msk.msra.mxu0 %vm491_vm6, %v1173_v18  ;;  %vm910_vm6 = vcmask 269312  }
 0x37f   : > { %1116 = vmatprep.subr.mxu0 %v1170_v2 }
 0x381   : > { %1112 = vmatmul.mubr.msk.f32.gmra.mxu0 %vm804_vm4, %v803_v52 }
 0x382   : > { %1124 = vmatprep.mubr.msk.f32.mxu0 %vm1175_vm5, %v1170_v2 }
 0x43d   : > { %v1110_v53 = vpop.f32.mrf.mxu0 }
 0x43e   : > { %v906_v32 = vmax.f32 %v1110_v53, 0.0 }
 0x43f   : > { %v886_v54 = vpop.f32.mrf.mxu0 }
 0x440   : > { %v905_v18 = vmax.f32 %v886_v54, 0.0 }
 0x441   : > { %v1113_v55 = vpop.f32.mrf.mxu0 }
 0x442   : > { %v908_v23 = vmax.f32 %v1113_v55, 0.0 }
 0x443   : > { %v896_v24 = vpop.f32.mrf.mxu0 }
 0x444   : > { %v907_v56 = vmax.f32 %v896_v24, 0.0  ;;  %1117 = vmatpush3.msra.mxu0 %v908_v23 }
 0x445   : > { %1118 = vmatprep.subr.mxu0 %v1170_v2 }
 0x446   : > { %1119 = vmatpush3.msra.mxu0 %v907_v56 }
 0x447   : > { %1120 = vmatprep.subr.mxu0 %v1170_v2 }
 0x448   : > { %1121 = vmatpush3.msra.mxu0 %v906_v32 }
 0x449   : > { %1122 = vmatprep.subr.mxu0 %v1170_v2 }
 0x44a   : > { %1123 = vmatpush3.msra.mxu0 %v905_v18 }
 0x44b   : > { %1125 = vmatmul.mubr.msk.f32.vlgmr.msra.gmra.mxu0 %vm910_vm6, %v909_v57 }
 0x50b   : > { %v980_v27 = vpop.f32.mrf.mxu0 }
 0x50c   : > { %v985_v58 = vsel %vm984_vm7, %v980_v27, 0.0 }
 0x50d   : > { %986 = vst [vmem:[%s285_s22] sm:$0x1] %v985_v58  ;;  %v1126_v28 = vpop.f32.mrf.mxu0 }
 0x50e PF: > { %s18_s24 = sadd.s32 1, %s1162_s24  }
 0x50f   : > { %p15_p4 = scmp.ge.s32.totalorder %s18_s24, 4  }
 0x511   :  { %17 = sbr.rel (!%p15_p4) target bundleno = 1 (0x1), region = 86 }

</bundles_post_ra>
